<compile_context>
chip_gen: v6e
topology: v6e:2x2x1
jax: 0.10.0
libtpu: 0.0.40
codegen_flags: <defaults>
</compile_context>

<pallas_src>
import functools

import jax
import jax.numpy as jnp
from jax.experimental import pallas as pl
from jax.experimental.pallas import tpu as pltpu


def _round_up(v: int, mult: int) -> int:
    return ((v + mult - 1) // mult) * mult


def _linear_kernel(x_ref, w_ref, o_ref, *, k_total, tk, compute_dtype):
    """One (tn, tm) output tile, accumulated in-place over the K grid axis.

    x_ref: (tn, tk)  activation tile
    w_ref: (tk, tm)  weight tile, already in (in_features, out_features) layout
    o_ref: (tn, tm)  f32 output tile (doubles as the accumulator)
    """
    k_idx = pl.program_id(2)

    @pl.when(k_idx == 0)
    def _init():
        o_ref[...] = jnp.zeros_like(o_ref)

    x_tile = x_ref[...]
    w_tile = w_ref[...]

    if k_total % tk != 0:
        # Ragged K: the last K block reads past the array; zero the tail of
        # BOTH operands so uninitialized (possibly NaN) VMEM cannot pollute
        # the accumulator (0 * NaN = NaN otherwise).  Emitted only when a
        # remainder exists; all-true for non-last blocks.
        k_base = k_idx * tk
        x_col = jax.lax.broadcasted_iota(jnp.int32, x_tile.shape, 1)
        x_tile = jnp.where(k_base + x_col < k_total, x_tile, 0.0)
        w_row = jax.lax.broadcasted_iota(jnp.int32, w_tile.shape, 0)
        w_tile = jnp.where(k_base + w_row < k_total, w_tile, 0.0)

    # (tn, tk) x (tk, tm) -> (tn, tm); bf16 operands, f32 accumulation.
    o_ref[...] += jax.lax.dot_general(
        x_tile.astype(compute_dtype),
        w_tile.astype(compute_dtype),
        dimension_numbers=(((1,), (0,)), ((), ())),
        preferred_element_type=jnp.float32,
    )


def prepare_weight(weight):
    """One-time parameter layout change: (out, in) -> (in, out).

    Done at "parameter-load time", outside the per-call hot path, so the
    kernel always consumes the weight in canonical RHS layout.
    """
    return jnp.asarray(weight).T


def slpnet_forward(x, weight_t, *, compute_dtype=jnp.bfloat16,
                   tn=512, tm=512, tk=512):
    """y = x @ W.T  (bias-free linear layer, PyTorch semantics).

    x:        (N, input_size)            float32
    weight_t: (input_size, output_size)  float32  (pre-transposed, see
                                                   prepare_weight)
    returns   (N, output_size)           float32
    """
    n, k = x.shape
    k2, m = weight_t.shape
    assert k == k2, "input_size mismatch"

    # Small-batch (GEMV-like) regime: the kernel is weight-bandwidth bound.
    # Keep the N tile clamped to n and enlarge the weight block so each grid
    # step streams ~2 MiB of weight (amortizes the ~0.35 us/step overhead).
    if n <= 64:
        tm, tk = 512, 1024

    tn_eff = min(tn, _round_up(n, 8))      # sublane-aligned
    tm_eff = min(tm, _round_up(m, 128))    # lane-dense output stores
    tk_eff = min(tk, _round_up(k, 128))    # lane-aligned contraction

    grid_n = pl.cdiv(n, tn_eff)
    # v7x megacore: "parallel" grid axes are sharded across the 2 TensorCores.
    # If the N axis is a single block, make sure M contributes >= 2 blocks.
    if grid_n == 1 and m > 128:
        tm_eff = min(tm_eff, _round_up(pl.cdiv(m, 2), 128))
    grid_m = pl.cdiv(m, tm_eff)
    grid_k = pl.cdiv(k, tk_eff)

    cost = pl.CostEstimate(
        flops=2 * n * m * k,
        transcendentals=0,
        # Account for re-reads: x is read once per M block, W once per N block.
        bytes_accessed=4 * (n * k * grid_m + k * m * grid_n + n * m),
    )

    kernel = functools.partial(
        _linear_kernel, k_total=k, tk=tk_eff, compute_dtype=compute_dtype)

    return pl.pallas_call(
        kernel,
        out_shape=jax.ShapeDtypeStruct((n, m), jnp.float32),
        grid=(grid_n, grid_m, grid_k),
        in_specs=[
            pl.BlockSpec((tn_eff, tk_eff), lambda i, j, kk: (i, kk)),
            # Tuning knob if xprof shows exposed weight DMA in the small-batch
            # regime: add pipeline_mode=pl.Buffered(3) to this spec.
            pl.BlockSpec((tk_eff, tm_eff), lambda i, j, kk: (kk, j)),
        ],
        out_specs=pl.BlockSpec((tn_eff, tm_eff), lambda i, j, kk: (i, j)),
        compiler_params=pltpu.CompilerParams(
            dimension_semantics=("parallel", "parallel", "arbitrary"),
            vmem_limit_bytes=32 * 1024 * 1024,  # ample on v5e/v6e/v7x
        ),
        cost_estimate=cost,
    )(x, weight_t)


if __name__ == "__main__":
    key = jax.random.PRNGKey(0)
    k_w, k_x = jax.random.split(key)

    # Small, module-consistent shapes: a batch of feature vectors.
    batch = 8
    input_size = 32
    output_size = 16

    # Deterministic parameter init mirroring nn.init.normal_(W, 0.0, 1.0),
    # in the native nn.Linear (out_features, in_features) layout.
    weight = jax.random.normal(k_w, (output_size, input_size), dtype=jnp.float32)
    x = jax.random.normal(k_x, (batch, input_size), dtype=jnp.float32)

    # One-time layout change at parameter-load time.
    weight_t = prepare_weight(weight)

    y = slpnet_forward(x, weight_t)
    jax.block_until_ready(y)

    # Correctness check against the pure-JAX reference of the PyTorch forward.
    # Tolerance sized for bf16 MXU operands with f32 accumulation.
    y_ref = jnp.dot(x, weight.T, precision=jax.lax.Precision.HIGHEST)
    assert y.shape == (batch, output_size)
    assert jnp.allclose(y, y_ref, atol=1e-1, rtol=3e-2)

    print("KERNEL_OK")
</pallas_src>

<mosaic_0001>
module attributes {stable_mosaic.version = 11 : i64} {
  func.func @_linear_kernel(%arg0: i32, %arg1: i32, %arg2: i32, %arg3: memref<8x128xf32, #tpu.memory_space<vmem>>, %arg4: memref<128x128xf32, #tpu.memory_space<vmem>>, %arg5: memref<8x128xf32, #tpu.memory_space<vmem>>) attributes {dimension_semantics = [#tpu.dimension_semantics<parallel>, #tpu.dimension_semantics<parallel>, #tpu.dimension_semantics<arbitrary>], iteration_bounds = array<i64: 1, 1, 1>, scalar_prefetch = 0 : i64, scratch_operands = 0 : i64, tpu.core_type = #tpu.core_type<tc>, window_params = [{transform_indices = @transform_0, window_bounds = array<i64: 8, 128>}, {transform_indices = @transform_1, window_bounds = array<i64: 128, 128>}, {transform_indices = @transform_2, window_bounds = array<i64: 8, 128>}]} {
    %c0_i32 = arith.constant 0 : i32
    %0 = arith.cmpi eq, %arg2, %c0_i32 : i32
    %1 = arith.extui %0 : i1 to i32
    %c0_i32_0 = arith.constant 0 : i32
    %2 = arith.cmpi ne, %1, %c0_i32_0 : i32
    scf.if %2 {
      %cst_11 = arith.constant 0.000000e+00 : f32
      %26 = vector.broadcast %cst_11 : f32 to vector<8x128xf32>
      %c0_12 = arith.constant 0 : index
      %c0_13 = arith.constant 0 : index
      %27 = vector.load %arg5[%c0_12, %c0_13] : memref<8x128xf32, #tpu.memory_space<vmem>>, vector<8x128xf32>
      tpu.vector_store %arg5[%c0_12, %c0_13], %26 {strides = array<i32>} : memref<8x128xf32, #tpu.memory_space<vmem>>, vector<8x128xf32>,
    } else {
    }
    %c0 = arith.constant 0 : index
    %c0_1 = arith.constant 0 : index
    %3 = vector.load %arg3[%c0, %c0_1] : memref<8x128xf32, #tpu.memory_space<vmem>>, vector<8x128xf32>
    %c0_2 = arith.constant 0 : index
    %c0_3 = arith.constant 0 : index
    %4 = vector.load %arg4[%c0_2, %c0_3] : memref<128x128xf32, #tpu.memory_space<vmem>>, vector<128x128xf32>
    %c128_i32 = arith.constant 128 : i32
    %5 = arith.muli %arg2, %c128_i32 : i32
    %6 = tpu.iota {dimensions = array<i32: 1>} : vector<8x128xi32>
    %7 = vector.broadcast %5 : i32 to vector<8x128xi32>
    %8 = arith.addi %7, %6 : vector<8x128xi32>
    %c32_i32 = arith.constant 32 : i32
    %9 = vector.broadcast %c32_i32 : i32 to vector<8x128xi32>
    %10 = arith.cmpi slt, %8, %9 : vector<8x128xi32>
    %cst = arith.constant 0.000000e+00 : f32
    %11 = vector.broadcast %cst : f32 to vector<8x128xf32>
    %12 = arith.select %10, %3, %11 : vector<8x128xi1>, vector<8x128xf32>
    %13 = tpu.iota {dimensions = array<i32: 0>} : vector<128x128xi32>
    %14 = vector.broadcast %5 : i32 to vector<128x128xi32>
    %15 = arith.addi %14, %13 : vector<128x128xi32>
    %c32_i32_4 = arith.constant 32 : i32
    %16 = vector.broadcast %c32_i32_4 : i32 to vector<128x128xi32>
    %17 = arith.cmpi slt, %15, %16 : vector<128x128xi32>
    %cst_5 = arith.constant 0.000000e+00 : f32
    %18 = vector.broadcast %cst_5 : f32 to vector<128x128xf32>
    %19 = arith.select %17, %4, %18 : vector<128x128xi1>, vector<128x128xf32>
    %c0_6 = arith.constant 0 : index
    %c0_7 = arith.constant 0 : index
    %20 = vector.load %arg5[%c0_6, %c0_7] : memref<8x128xf32, #tpu.memory_space<vmem>>, vector<8x128xf32>
    %21 = arith.truncf %12 : vector<8x128xf32> to vector<8x128xbf16>
    %22 = arith.truncf %19 : vector<128x128xf32> to vector<128x128xbf16>
    %cst_8 = arith.constant dense<0.000000e+00> : vector<8x128xf32>
    %23 = tpu.matmul %21, %22, %cst_8 {dimension_numbers = #tpu.dot_dimension_numbers<[1], [0], [0], [1], [0, 0, 1, 1], [], []>} : vector<8x128xbf16>, vector<128x128xbf16>, vector<8x128xf32> -> vector<8x128xf32>
    %24 = arith.addf %20, %23 : vector<8x128xf32>
    %c0_9 = arith.constant 0 : index
    %c0_10 = arith.constant 0 : index
    %25 = vector.load %arg5[%c0_9, %c0_10] : memref<8x128xf32, #tpu.memory_space<vmem>>, vector<8x128xf32>
    tpu.vector_store %arg5[%c0_9, %c0_10], %24 {strides = array<i32>} : memref<8x128xf32, #tpu.memory_space<vmem>>, vector<8x128xf32>,
    return
  }
  func.func @transform_0(%arg0: i32, %arg1: i32, %arg2: i32) -> (i32, i32) {
    %c0_i32 = arith.constant 0 : i32
    return %arg0, %arg2 : i32, i32
  }
  func.func @transform_1(%arg0: i32, %arg1: i32, %arg2: i32) -> (i32, i32) {
    %c0_i32 = arith.constant 0 : i32
    return %arg2, %arg1 : i32, i32
  }
  func.func @transform_2(%arg0: i32, %arg1: i32, %arg2: i32) -> (i32, i32) {
    %c0_i32 = arith.constant 0 : i32
    return %arg0, %arg1 : i32, i32
  }
}

</mosaic_0001>

<bundles_post_ra>
// kernel: tpu_custom_call.1
= control target key start
LH: loop header
LB: loop body
LE: loop exit
PB: predicated region body
PF: predicated region fallthrough
CT: control target
= control target key end

     0   :  { %v36_v3 = vlaneseq  ;;  %v212_v4 = vmov 0.0   ;;  %vm213_vm0 = vmmov 0   ;;  %s248_s0 = inlined_call_operand.vmem [shape: f32[8,32], index: 0, kind: input, shape index: {}]   ;;  %s249_s1 = inlined_call_operand.vmem [shape: f32[32,16], index: 1, kind: input, shape index: {}]   ;;  %s250_s2 = inlined_call_operand.hbm [shape: f32[8,16], index: 2, kind: output, shape index: {}]  }
   0x1   :  { %v21_v0 = vld [vmem:[%s249_s1 + $0x10] sm:$0xff]  ;;  %v22_v1 = vld [vmem:[%s249_s1 + $0x18] sm:$0xff]  ;;  %v19_v2 = vld [vmem:[%s249_s1] sm:$0xff]  ;;  %179 = vmatprep.subr.bf16.mxu0 %v212_v4  ;;  %183 = vmatprep.mubr.msk.bf16.mxu0 %vm213_vm0, %v212_v4 }
   0x2   :  { %v110_v5 = vpack.c.bf16 %v22_v1, %v21_v0  ;;  %v20_v6 = vld [vmem:[%s249_s1 + $0x8] sm:$0xff] }
   0x3   :  { %7 = vsyncpa [#allocation3], 0  ;;  %v37_v7 = vand.u32 127, %v36_v3  ;;  %v109_v8 = vpack.c.bf16 %v20_v6, %v19_v2  ;;  %v18_v9 = vld [vmem:[%s248_s0] sm:$0xff]  ;;  %s214_s19 = smov [#allocation2]  }
   0x4   :  { %180 = vmatpush3.bf16.msra.mxu0 %v110_v5  ;;  %v174_v10 = vpack.c.bf16 %v18_v9, %v18_v9  ;;  %s165_s20 = sshll.u32 %s214_s19, 4  ;;  %s166_s20 = int_to_ptr.vmem [resolvable:$true] %s165_s20 }
   0x5   :  { %181 = vmatprep.subr.bf16.mxu0 %v212_v4  ;;  %vm40_vm1 = vcmp.lt.s32.totalorder %v37_v7, 32  ;;  %s190_s1 = scalar_lea.vmem %s166_s20, 128  ;;  %p195_p1 = scmp.lt.s32.totalorder %s166_s20, %s166_s20 }
   0x6   :  { %vm173_vm2 = vmpackc.low %vm40_vm1, %vm40_vm1  ;;  %p191_p0 = scmp.ne.s32.totalorder %s166_s20, %s190_s1  ;;  %p196_p2 = scmp.lt.s32.totalorder %s190_s1, %s190_s1 }
   0x8   :  { %182 = vmatpush3.bf16.msra.mxu0 %v109_v8  ;;  %p197_p3 = por %p196_p2, %p195_p1 }
   0xa   :  { %p198_p4 = pnand %p197_p3, %p191_p0 }
   0xb   :  { %184 = vmatmul.mubr.msk.bf16.vlgmr.msra.gmra.mxu0 %vm173_vm2, %v174_v10 }
  0xcb   :  { %v151_v11 = vpop.f32.mrf.mxu0 }
  0xcc   :  { %158 = vst [vmem:[#allocation2] sm:$0xff] %v151_v11 }
  0xcd   :  { %v185_v12 = vpop.f32.mrf.mxu0 }
  0xcf   :  { %v154_v13 = vpop.f32.mrf.mxu0 }
  0xd0   :  { %201 = shalt.err (!%p198_p4)
}
  0xd1   :  { %168 = dma.vmem_to_hbm [thread:$0]  %s166_s20, 128, %s250_s2, [#allocation3]   ;;  %v186_v14 = vpop.f32.mrf.mxu0 }
  0xd2   :  { %210 = dma.done.wait [#allocation3], 128  }
  0xd3   :  { %211 = vsyncadd [#allocation3], 4294967168 }
  0xd4   :  { %172 = vsyncpa [#allocation3], 1 }

</bundles_post_ra>
